<compile_context>
chip_gen: v6e
topology: v6e:2x2x1
jax: 0.10.0
libtpu: 0.0.40
codegen_flags: <defaults>
</compile_context>

<pallas_src>
import jax
import jax.numpy as jnp
from jax.experimental import pallas as pl
from jax.experimental.pallas import tpu as pltpu


def _round_up(n, m):
    return ((n + m - 1) // m) * m


_MAX_TILE = 1024  # rows per grid step; measured DMA-amortization sweet spot


def _num_tensorcores():
    """Best-effort TensorCore-per-device count (v7x has 2). Falls back to 1."""
    try:
        return max(1, int(getattr(jax.devices()[0], "num_cores", 1)))
    except Exception:  # pragma: no cover - detection is advisory only
        return 1


def _resolve_tile(batch, block_batch, num_cores):
    """Pick the per-step batch tile.

    Rules (per review): grid=1 (block == full array -> no padding, no (8,128)
    constraint) on single-TC parts; one multiple-of-128 tile per TensorCore on
    multi-TC parts; cap at _MAX_TILE for very large batches. When grid > 1 the
    tile must be a multiple of 128 so the lane-dense (1, tb) output block is legal.
    """
    if block_batch is not None:
        tb = min(int(block_batch), batch)
        if tb < batch:
            tb = max(128, (tb // 128) * 128)  # lane-dense output needs 128-multiples
        return tb
    if num_cores > 1 and batch >= 256:
        tb = min(_MAX_TILE, _round_up(pl.cdiv(batch, num_cores), 128))
        if tb < batch:
            return tb
    if batch <= _MAX_TILE:
        return batch  # single grid step; blocks equal the full arrays
    return _MAX_TILE


def make_mlp_kernel(num_hidden):
    """Fused MLP kernel.

    Ref order: x_ref, (w_i bf16 (in,out), b_i f32 (1,out)) * num_hidden,
               w_last f32 (1, in_last), b_last f32 (1, 1), o_ref (1, tb) f32.
    """

    def kernel(*refs):
        x_ref = refs[0]
        o_ref = refs[-1]
        # bf16 MXU inputs, f32 accumulation. astype is a no-op if x arrives bf16.
        h = x_ref[...].astype(jnp.bfloat16)
        for i in range(num_hidden):
            w = refs[1 + 2 * i][...]                       # (in, out) bf16
            b = refs[2 + 2 * i][...]                       # (1, out) f32
            z = jnp.dot(h, w, preferred_element_type=jnp.float32) + b
            z = jnp.maximum(z, 0.0)                        # ReLU (+ Dropout = id, eval)
            # Keep activations bf16 between hidden layers; the last hidden
            # output stays f32 for the f32 head.
            h = z.astype(jnp.bfloat16) if i + 1 < num_hidden else z
        w_last = refs[-3][...]                             # (1, in_last) f32
        b_last = refs[-2][...]                             # (1, 1) f32
        # Head Linear(., 1): contract the feature axis of both operands so the
        # result is already a lane-dense (1, tb) row (flash-attention-style
        # rhs-minor contraction) -> unmasked full-lane store below.
        logit = jnp.einsum("of,bf->ob", w_last, h,
                           preferred_element_type=jnp.float32) + b_last
        # Exact sigmoid; exp goes to the EUP slot, the divide is cheap at (1, tb).
        o_ref[...] = 1.0 / (1.0 + jnp.exp(-logit))

    return kernel


def trading_model_forward(x, params, *, block_batch=None, num_cores=None):
    """x: (batch, input_size) f32 or bf16. params: list of (W (in,out), b (1,out))."""
    batch, in_features = x.shape
    num_hidden = len(params) - 1

    if num_cores is None:
        num_cores = _num_tensorcores()
    tb = _resolve_tile(batch, block_batch, num_cores)

    padded_batch = _round_up(batch, tb)
    x_in = x
    if padded_batch != batch:
        # Only reachable for large / ragged batches with grid > 1.
        # TODO(synk): mask the ragged tail block in-kernel to avoid this extra HBM pass.
        x_in = jnp.pad(x, ((0, padded_batch - batch), (0, 0)))

    # Hidden weights in bf16 (halves resident-weight VMEM + weight DMA bytes),
    # biases f32. Head weight pre-transposed to (1, in_last) f32 for the einsum.
    flat_inputs = [x_in]
    for w, b in params[:-1]:
        flat_inputs.append(w.astype(jnp.bfloat16))
        flat_inputs.append(b.astype(jnp.float32))
    w_last, b_last = params[-1]
    flat_inputs.append(jnp.transpose(w_last).astype(jnp.float32))   # (1, in_last)
    flat_inputs.append(b_last.reshape(1, 1).astype(jnp.float32))    # (1, 1)

    grid = (padded_batch // tb,)

    def _resident_spec(shape):
        zeros = (0,) * len(shape)
        # constant index_map -> DMA'd once, stays VMEM-resident across the grid
        return pl.BlockSpec(shape, lambda i, _z=zeros: _z)

    in_specs = [pl.BlockSpec((tb, in_features), lambda i: (i, 0))]
    in_specs += [_resident_spec(a.shape) for a in flat_inputs[1:]]
    # Lane-dense output: (1, padded_batch) array, (1, tb) block per step.
    out_specs = pl.BlockSpec((1, tb), lambda i: (0, i))

    # Advisory cost estimate so XLA can schedule around this tiny custom call.
    flops = 2 * padded_batch * sum(int(w.shape[0]) * int(w.shape[1]) for w, _ in params)
    bytes_accessed = int(
        x_in.size * x_in.dtype.itemsize
        + padded_batch * 4
        + sum(int(a.size) * a.dtype.itemsize for a in flat_inputs[1:])
    )
    cost = pl.CostEstimate(flops=int(flops), transcendentals=int(padded_batch),
                           bytes_accessed=bytes_accessed)

    out = pl.pallas_call(
        make_mlp_kernel(num_hidden),
        out_shape=jax.ShapeDtypeStruct((1, padded_batch), jnp.float32),
        grid=grid,
        in_specs=in_specs,
        out_specs=out_specs,
        compiler_params=pltpu.CompilerParams(
            # batch axis is embarrassingly parallel -> splits across v7x's 2 TCs
            dimension_semantics=("parallel",),
            # explicit budget with headroom; footprint here is <~2 MiB on all gens
            vmem_limit_bytes=32 * 1024 * 1024,
        ),
        cost_estimate=cost,
    )(*flat_inputs)

    return jnp.reshape(out, (padded_batch, 1))[:batch]


def init_params(key, input_size, hidden_layers):
    """Deterministic synthetic parameters matching TradingModel.__init__ shapes."""
    sizes = [input_size] + list(hidden_layers) + [1]
    params = []
    for i in range(len(sizes) - 1):
        key, kw, kb = jax.random.split(key, 3)
        fan_in, fan_out = sizes[i], sizes[i + 1]
        w = jax.random.normal(kw, (fan_in, fan_out), dtype=jnp.float32) * (1.0 / jnp.sqrt(fan_in))
        b = jax.random.normal(kb, (1, fan_out), dtype=jnp.float32) * 0.01
        params.append((w, b))
    return params


def reference_forward(x, params):
    """Pure-JAX reference of the PyTorch forward (eval mode), mirroring the kernel's
    mixed precision (bf16 hidden weights/activations, f32 accumulation, f32 head)."""
    num_hidden = len(params) - 1
    h = x.astype(jnp.bfloat16)
    for i, (w, b) in enumerate(params[:-1]):
        z = jnp.dot(h, w.astype(jnp.bfloat16), preferred_element_type=jnp.float32) + b
        z = jnp.maximum(z, 0.0)
        h = z.astype(jnp.bfloat16) if i + 1 < num_hidden else z
    w_last, b_last = params[-1]
    logit = h @ w_last + b_last
    return jax.nn.sigmoid(logit)


if __name__ == "__main__":
    # Shapes consistent with the module: input_size=32, hidden=[64, 32].
    input_size = 32
    hidden_layers = [64, 32]
    dropout_rate = 0.1  # identity in eval mode
    batch = 256

    key = jax.random.PRNGKey(0)
    kx, kp = jax.random.split(key)
    x = jax.random.normal(kx, (batch, input_size), dtype=jnp.float32)
    params = init_params(kp, input_size, hidden_layers)

    ref = reference_forward(x, params)

    # (a) auto tiling: one grid step per TensorCore (grid=1 on single-TC parts).
    out_a = jax.block_until_ready(trading_model_forward(x, params))
    # (b) explicit 128-row tiles: exercises the multi-step, parallel-grid path.
    out_b = jax.block_until_ready(trading_model_forward(x, params, block_batch=128))

    for out in (out_a, out_b):
        assert out.shape == (batch, 1)
        assert jnp.allclose(out, ref, atol=5e-3, rtol=5e-3), "mismatch vs reference"

    print("KERNEL_OK")
</pallas_src>

<mosaic_0001>
module attributes {stable_mosaic.version = 11 : i64} {
  func.func @kernel(%arg0: i32, %arg1: memref<256x32xf32, #tpu.memory_space<vmem>>, %arg2: memref<32x64xbf16, #tpu.memory_space<vmem>>, %arg3: memref<1x64xf32, #tpu.memory_space<vmem>>, %arg4: memref<64x32xbf16, #tpu.memory_space<vmem>>, %arg5: memref<1x32xf32, #tpu.memory_space<vmem>>, %arg6: memref<1x32xf32, #tpu.memory_space<vmem>>, %arg7: memref<1x1xf32, #tpu.memory_space<vmem>>, %arg8: memref<1x256xf32, #tpu.memory_space<vmem>>) attributes {dimension_semantics = [#tpu.dimension_semantics<parallel>], iteration_bounds = array<i64: 1>, scalar_prefetch = 0 : i64, scratch_operands = 0 : i64, tpu.core_type = #tpu.core_type<tc>, window_params = [{transform_indices = @transform_0, window_bounds = array<i64: 256, 32>}, {pipeline_mode = #tpu.pipeline_mode<synchronous>, transform_indices = @transform_1, window_bounds = array<i64: 32, 64>}, {pipeline_mode = #tpu.pipeline_mode<synchronous>, transform_indices = @transform_2, window_bounds = array<i64: 1, 64>}, {pipeline_mode = #tpu.pipeline_mode<synchronous>, transform_indices = @transform_3, window_bounds = array<i64: 64, 32>}, {pipeline_mode = #tpu.pipeline_mode<synchronous>, transform_indices = @transform_4, window_bounds = array<i64: 1, 32>}, {pipeline_mode = #tpu.pipeline_mode<synchronous>, transform_indices = @transform_5, window_bounds = array<i64: 1, 32>}, {pipeline_mode = #tpu.pipeline_mode<synchronous>, transform_indices = @transform_6, window_bounds = array<i64: 1, 1>}, {transform_indices = @transform_7, window_bounds = array<i64: 1, 256>}]} {
    %c0 = arith.constant 0 : index
    %c0_0 = arith.constant 0 : index
    %0 = vector.load %arg1[%c0, %c0_0] : memref<256x32xf32, #tpu.memory_space<vmem>>, vector<256x32xf32>
    %1 = arith.truncf %0 : vector<256x32xf32> to vector<256x32xbf16>
    %c0_1 = arith.constant 0 : index
    %c0_2 = arith.constant 0 : index
    %2 = vector.load %arg2[%c0_1, %c0_2] : memref<32x64xbf16, #tpu.memory_space<vmem>>, vector<32x64xbf16>
    %c0_3 = arith.constant 0 : index
    %c0_4 = arith.constant 0 : index
    %3 = vector.load %arg3[%c0_3, %c0_4] : memref<1x64xf32, #tpu.memory_space<vmem>>, vector<1x64xf32>
    %cst = arith.constant dense<0.000000e+00> : vector<256x64xf32>
    %4 = tpu.matmul %1, %2, %cst {dimension_numbers = #tpu.dot_dimension_numbers<[1], [0], [0], [1], [0, 0, 1, 1], [], []>} : vector<256x32xbf16>, vector<32x64xbf16>, vector<256x64xf32> -> vector<256x64xf32>
    %5 = vector.broadcast %3 : vector<1x64xf32> to vector<256x64xf32>
    %6 = arith.addf %4, %5 : vector<256x64xf32>
    %cst_5 = arith.constant 0.000000e+00 : f32
    %7 = vector.broadcast %cst_5 : f32 to vector<256x64xf32>
    %8 = arith.maximumf %6, %7 : vector<256x64xf32>
    %9 = arith.truncf %8 : vector<256x64xf32> to vector<256x64xbf16>
    %c0_6 = arith.constant 0 : index
    %c0_7 = arith.constant 0 : index
    %10 = vector.load %arg4[%c0_6, %c0_7] : memref<64x32xbf16, #tpu.memory_space<vmem>>, vector<64x32xbf16>
    %c0_8 = arith.constant 0 : index
    %c0_9 = arith.constant 0 : index
    %11 = vector.load %arg5[%c0_8, %c0_9] : memref<1x32xf32, #tpu.memory_space<vmem>>, vector<1x32xf32>
    %cst_10 = arith.constant dense<0.000000e+00> : vector<256x32xf32>
    %12 = tpu.matmul %9, %10, %cst_10 {dimension_numbers = #tpu.dot_dimension_numbers<[1], [0], [0], [1], [0, 0, 1, 1], [], []>} : vector<256x64xbf16>, vector<64x32xbf16>, vector<256x32xf32> -> vector<256x32xf32>
    %13 = vector.broadcast %11 : vector<1x32xf32> to vector<256x32xf32>
    %14 = arith.addf %12, %13 : vector<256x32xf32>
    %cst_11 = arith.constant 0.000000e+00 : f32
    %15 = vector.broadcast %cst_11 : f32 to vector<256x32xf32>
    %16 = arith.maximumf %14, %15 : vector<256x32xf32>
    %c0_12 = arith.constant 0 : index
    %c0_13 = arith.constant 0 : index
    %17 = vector.load %arg6[%c0_12, %c0_13] : memref<1x32xf32, #tpu.memory_space<vmem>>, vector<1x32xf32>
    %c0_14 = arith.constant 0 : index
    %c0_15 = arith.constant 0 : index
    %18 = vector.load %arg7[%c0_14, %c0_15] : memref<1x1xf32, #tpu.memory_space<vmem>>, vector<1x1xf32>
    "tpu.trace_start"() <{level = 10 : i32, message = "of,bf->ob"}> : () -> ()
    %cst_16 = arith.constant dense<0.000000e+00> : vector<1x256xf32>
    %19 = tpu.matmul %17, %16, %cst_16 {dimension_numbers = #tpu.dot_dimension_numbers<[1], [1], [0], [0], [0, 0, 1, 0], [], []>} : vector<1x32xf32>, vector<256x32xf32>, vector<1x256xf32> -> vector<1x256xf32>
    "tpu.trace_stop"() : () -> ()
    %20 = vector.broadcast %18 : vector<1x1xf32> to vector<1x256xf32>
    %21 = arith.addf %19, %20 : vector<1x256xf32>
    %cst_17 = arith.constant 0.000000e+00 : f32
    %22 = vector.broadcast %cst_17 : f32 to vector<1x256xf32>
    %23 = arith.subf %22, %21 : vector<1x256xf32>
    %24 = math.exp %23 : vector<1x256xf32>
    %cst_18 = arith.constant 1.000000e+00 : f32
    %25 = vector.broadcast %cst_18 : f32 to vector<1x256xf32>
    %26 = arith.addf %25, %24 : vector<1x256xf32>
    %cst_19 = arith.constant 1.000000e+00 : f32
    %27 = vector.broadcast %cst_19 : f32 to vector<1x256xf32>
    %28 = arith.divf %27, %26 : vector<1x256xf32>
    %c0_20 = arith.constant 0 : index
    %c0_21 = arith.constant 0 : index
    %29 = vector.load %arg8[%c0_20, %c0_21] : memref<1x256xf32, #tpu.memory_space<vmem>>, vector<1x256xf32>
    tpu.vector_store %arg8[%c0_20, %c0_21], %28 {strides = array<i32>} : memref<1x256xf32, #tpu.memory_space<vmem>>, vector<1x256xf32>,
    return
  }
  func.func @transform_0(%arg0: i32) -> (i32, i32) {
    %c0_i32 = arith.constant 0 : i32
    %c0_i32_0 = arith.constant 0 : i32
    return %arg0, %c0_i32 : i32, i32
  }
  func.func @transform_1(%arg0: i32) -> (i32, i32) {
    %c0_i32 = arith.constant 0 : i32
    %c0_i32_0 = arith.constant 0 : i32
    %c0_i32_1 = arith.constant 0 : i32
    return %c0_i32, %c0_i32_0 : i32, i32
  }
  func.func @transform_2(%arg0: i32) -> (i32, i32) {
    %c0_i32 = arith.constant 0 : i32
    %c0_i32_0 = arith.constant 0 : i32
    %c0_i32_1 = arith.constant 0 : i32
    return %c0_i32, %c0_i32_0 : i32, i32
  }
  func.func @transform_3(%arg0: i32) -> (i32, i32) {
    %c0_i32 = arith.constant 0 : i32
    %c0_i32_0 = arith.constant 0 : i32
    %c0_i32_1 = arith.constant 0 : i32
    return %c0_i32, %c0_i32_0 : i32, i32
  }
  func.func @transform_4(%arg0: i32) -> (i32, i32) {
    %c0_i32 = arith.constant 0 : i32
    %c0_i32_0 = arith.constant 0 : i32
    %c0_i32_1 = arith.constant 0 : i32
    return %c0_i32, %c0_i32_0 : i32, i32
  }
  func.func @transform_5(%arg0: i32) -> (i32, i32) {
    %c0_i32 = arith.constant 0 : i32
    %c0_i32_0 = arith.constant 0 : i32
    %c0_i32_1 = arith.constant 0 : i32
    return %c0_i32, %c0_i32_0 : i32, i32
  }
  func.func @transform_6(%arg0: i32) -> (i32, i32) {
    %c0_i32 = arith.constant 0 : i32
    %c0_i32_0 = arith.constant 0 : i32
    %c0_i32_1 = arith.constant 0 : i32
    return %c0_i32, %c0_i32_0 : i32, i32
  }
  func.func @transform_7(%arg0: i32) -> (i32, i32) {
    %c0_i32 = arith.constant 0 : i32
    %c0_i32_0 = arith.constant 0 : i32
    return %c0_i32, %arg0 : i32, i32
  }
}

</mosaic_0001>

<bundles_post_ra>
// kernel: tpu_custom_call.1
= control target key start
LH: loop header
LB: loop body
LE: loop exit
PB: predicated region body
PF: predicated region fallthrough
CT: control target
= control target key end

     0   :  { %s1486_s0 = inlined_call_operand.vmem [shape: f32[256,32], index: 0, kind: input, shape index: {}]   ;;  %s1487_s1 = inlined_call_operand.vmem [shape: bf16[32,64], index: 1, kind: input, shape index: {}]   ;;  %s1488_s2 = inlined_call_operand.vmem [shape: f32[1,64], index: 2, kind: input, shape index: {}]   ;;  %s1489_s3 = inlined_call_operand.vmem [shape: bf16[64,32], index: 3, kind: input, shape index: {}]   ;;  %s1490_s4 = inlined_call_operand.vmem [shape: f32[1,32], index: 4, kind: input, shape index: {}]   ;;  %s1491_s5 = inlined_call_operand.vmem [shape: f32[1,32], index: 5, kind: input, shape index: {}]   ;;  %s1492_s6 = inlined_call_operand.<no memory space> [shape: f32[1,1], index: 6, kind: input, shape index: {}]   ;;  %s1493_s7 = inlined_call_operand.hbm [shape: f32[1,256], index: 7, kind: output, shape index: {}]  }
   0x1   :  { %v12_v0 = vstv %s1492_s6 }
   0x2   :  { %13 = vst [vmem:[#allocation2] sm:$0x1] %v12_v0 }
   0x3   :  { %v1095_v1 = vld [vmem:[%s1487_s1 + $0x8] sm:$0xff]   ;;  %v1096_v2 = vld [vmem:[%s1487_s1] sm:$0xff]   ;;  %vm101_vm0 = vcmask 261120   ;;  %v32_v6 = vld [vmem:[%s1486_s0 + $0x10] sm:$0xff] }
   0x4   :  { %1015 = vmatprep.subr.bf16.mxu0 %v1095_v1  ;;  %v30_v3 = vld [vmem:[%s1486_s0] sm:$0xff]  ;;  %v31_v4 = vld [vmem:[%s1486_s0 + $0x8] sm:$0xff]  ;;  %v33_v7 = vld [vmem:[%s1486_s0 + $0x18] sm:$0xff] }
   0x5   :  { %1016 = vmatpush3.bf16.msra.mxu0 %v1095_v1  ;;  %v62_v5 = vpack.c.bf16 %v31_v4, %v30_v3  ;;  %v34_v8 = vld [vmem:[%s1486_s0 + $0x20] sm:$0xff]  ;;  %v35_v9 = vld [vmem:[%s1486_s0 + $0x28] sm:$0xff]  ;;  %v63_v10 = vpack.c.bf16 %v33_v7, %v32_v6  ;;  %v36_v12 = vld [vmem:[%s1486_s0 + $0x30] sm:$0xff] }
   0x6   :  { %1017 = vmatprep.subr.bf16.mxu0 %v1096_v2  ;;  %v64_v11 = vpack.c.bf16 %v35_v9, %v34_v8  ;;  %v37_v13 = vld [vmem:[%s1486_s0 + $0x38] sm:$0xff]  ;;  %v38_v14 = vld [vmem:[%s1486_s0 + $0x40] sm:$0xff]  ;;  %v39_v15 = vld [vmem:[%s1486_s0 + $0x48] sm:$0xff] }
   0x7   :  { %1019 = vmatprep.mubr.msk.bf16.mxu0 %vm101_vm0, %v62_v5  ;;  %v1097_v16 = vld [vmem:[%s1489_s3 + $0x18] sm:$0xff]   ;;  %v65_v17 = vpack.c.bf16 %v37_v13, %v36_v12  ;;  %v66_v18 = vpack.c.bf16 %v39_v15, %v38_v14 }
   0x8   :  { %1051 = vmatprep.subr.bf16.mxu1 %v1097_v16 }
   0x9   :  { %1018 = vmatpush3.bf16.msra.mxu0 %v1096_v2 }
   0xc   :  { %1020 = vmatmul.mubr.msk.bf16.vlgmr.msra.gmra.mxu0 %vm101_vm0, %v63_v10 }
   0xd   :  { %1023 = vmatprep.mubr.msk.bf16.mxu0 %vm101_vm0, %v64_v11 }
   0xe   :  { %14 = vsyncpa [#allocation4], 0  ;;  %1052 = vmatpush3.bf16.msra.mxu1 %v1097_v16  ;;  %v40_v19 = vld [vmem:[%s1486_s0 + $0x50] sm:$0xff]  ;;  %v41_v20 = vld [vmem:[%s1486_s0 + $0x58] sm:$0xff]  ;;  %vm398_vm1 = vcmask 523264  }
   0xf   :  { %v42_v21 = vld [vmem:[%s1486_s0 + $0x60] sm:$0xff]  ;;  %v43_v22 = vld [vmem:[%s1486_s0 + $0x68] sm:$0xff]  ;;  %v67_v23 = vpack.c.bf16 %v41_v20, %v40_v19  ;;  %v44_v25 = vld [vmem:[%s1486_s0 + $0x70] sm:$0xff] }
  0x10   :  { %v68_v24 = vpack.c.bf16 %v43_v22, %v42_v21  ;;  %v45_v26 = vld [vmem:[%s1486_s0 + $0x78] sm:$0xff]  ;;  %v46_v27 = vld [vmem:[%s1486_s0 + $0x80] sm:$0xff]  ;;  %v47_v28 = vld [vmem:[%s1486_s0 + $0x88] sm:$0xff] }
  0x11   :  { %v69_v29 = vpack.c.bf16 %v45_v26, %v44_v25  ;;  %v70_v30 = vpack.c.bf16 %v47_v28, %v46_v27  ;;  %v48_v31 = vld [vmem:[%s1486_s0 + $0x90] sm:$0xff]  ;;  %v49_v32 = vld [vmem:[%s1486_s0 + $0x98] sm:$0xff]  ;;  %v50_v33 = vld [vmem:[%s1486_s0 + $0xa0] sm:$0xff] }
  0x12   :  { %v51_v34 = vld [vmem:[%s1486_s0 + $0xa8] sm:$0xff]  ;;  %v71_v35 = vpack.c.bf16 %v49_v32, %v48_v31  ;;  %v52_v37 = vld [vmem:[%s1486_s0 + $0xb0] sm:$0xff]  ;;  %v53_v38 = vld [vmem:[%s1486_s0 + $0xb8] sm:$0xff] }
  0x13   :  { %v72_v36 = vpack.c.bf16 %v51_v34, %v50_v33  ;;  %v54_v39 = vld [vmem:[%s1486_s0 + $0xc0] sm:$0xff]  ;;  %v55_v40 = vld [vmem:[%s1486_s0 + $0xc8] sm:$0xff]  ;;  %v73_v41 = vpack.c.bf16 %v53_v38, %v52_v37  ;;  %v56_v43 = vld [vmem:[%s1486_s0 + $0xd0] sm:$0xff] }
  0x14   :  { %1024 = vmatmul.mubr.msk.bf16.gmra.mxu0 %vm101_vm0, %v65_v17  ;;  %v74_v42 = vpack.c.bf16 %v55_v40, %v54_v39  ;;  %v57_v44 = vld [vmem:[%s1486_s0 + $0xd8] sm:$0xff]  ;;  %v58_v45 = vld [vmem:[%s1486_s0 + $0xe0] sm:$0xff]  ;;  %v59_v46 = vld [vmem:[%s1486_s0 + $0xe8] sm:$0xff] }
  0x15   :  { %1027 = vmatprep.mubr.msk.bf16.mxu0 %vm101_vm0, %v66_v18  ;;  %v75_v47 = vpack.c.bf16 %v57_v44, %v56_v43  ;;  %v76_v48 = vpack.c.bf16 %v59_v46, %v58_v45  ;;  %v60_v49 = vld [vmem:[%s1486_s0 + $0xf0] sm:$0xff]  ;;  %v61_v50 = vld [vmem:[%s1486_s0 + $0xf8] sm:$0xff]  ;;  %v1099_v53 = vld [vmem:[%s1489_s3 + $0x8] sm:$0xff]  }
  0x16   :  { %v77_v51 = vpack.c.bf16 %v61_v50, %v60_v49  ;;  %v1098_v52 = vld [vmem:[%s1489_s3 + $0x10] sm:$0xff]   ;;  %v1100_v54 = vld [vmem:[%s1489_s3] sm:$0xff]  }
  0x17   :  { %1053 = vmatprep.subr.bf16.mxu1 %v1098_v52  ;;  %v1310_v57 = vld [vmem:[%s1488_s2] ss:$0 sm:$0xff] }
  0x18   :  { %1054 = vmatpush3.bf16.msra.mxu1 %v1098_v52 }
  0x19   :  { %1055 = vmatprep.subr.bf16.mxu1 %v1099_v53 }
  0x1c   :  { %1028 = vmatmul.mubr.msk.bf16.gmra.mxu0 %vm101_vm0, %v67_v23  ;;  %1056 = vmatpush3.bf16.msra.mxu1 %v1099_v53 }
  0x1d   :  { %1031 = vmatprep.mubr.msk.bf16.mxu0 %vm101_vm0, %v68_v24  ;;  %1057 = vmatprep.subr.bf16.mxu1 %v1100_v54 }
  0x20   :  { %1058 = vmatpush3.bf16.msra.mxu1 %v1100_v54 }
  0x24   :  { %1032 = vmatmul.mubr.msk.bf16.gmra.mxu0 %vm101_vm0, %v69_v29 }
  0x25   :  { %1035 = vmatprep.mubr.msk.bf16.mxu0 %vm101_vm0, %v70_v30 }
  0x2c   :  { %1036 = vmatmul.mubr.msk.bf16.gmra.mxu0 %vm101_vm0, %v71_v35 }
  0x2d   :  { %1039 = vmatprep.mubr.msk.bf16.mxu0 %vm101_vm0, %v72_v36 }
  0x34   :  { %1040 = vmatmul.mubr.msk.bf16.gmra.mxu0 %vm101_vm0, %v73_v41 }
  0x35   :  { %1043 = vmatprep.mubr.msk.bf16.mxu0 %vm101_vm0, %v74_v42 }
  0x3c   :  { %1044 = vmatmul.mubr.msk.bf16.gmra.mxu0 %vm101_vm0, %v75_v47 }
  0x3d   :  { %1047 = vmatprep.mubr.msk.bf16.mxu0 %vm101_vm0, %v76_v48 }
  0x44   :  { %1048 = vmatmul.mubr.msk.bf16.gmra.mxu0 %vm101_vm0, %v77_v51 }
  0xcc   :  { %v1021_v55 = vpop.f32.mrf.mxu0 }
  0xcd   :  { %v193_v61 = vadd.f32 %v1021_v55, %v1310_v57 }
  0xce   :  { %v184_v56 = vpop.f32.mrf.mxu0 }
  0xcf   :  { %v185_v59 = vadd.f32 %v1310_v57, %v184_v56  ;;  %v313_v4 = vmax.f32 %v193_v61, 0.0 }
  0xd0   :  { %v1022_v58 = vpop.f32.mrf.mxu0 }
  0xd1   :  { %v196_v60 = vadd.f32 %v1022_v58, %v1310_v57  ;;  %v311_v2 = vmax.f32 %v185_v59, 0.0 }
  0xd2   :  { %v187_v62 = vpop.f32.mrf.mxu0 }
  0xd3   :  { %v188_v63 = vadd.f32 %v1310_v57, %v187_v62  ;;  %v314_v0 = vmax.f32 %v196_v60, 0.0 }
  0xd4   :  { %v1025_v1 = vpop.f32.mrf.mxu0 }
  0xd5   :  { %v312_v3 = vmax.f32 %v188_v63, 0.0  ;;  %v344_v7 = vpack.c.bf16 %v314_v0, %v313_v4  ;;  %v209_v11 = vadd.f32 %v1025_v1, %v1310_v57 }
  0xd6   :  { %v200_v5 = vpop.f32.mrf.mxu0 }
  0xd7   :  { %v343_v6 = vpack.c.bf16 %v312_v3, %v311_v2  ;;  %v201_v9 = vadd.f32 %v1310_v57, %v200_v5  ;;  %v317_v18 = vmax.f32 %v209_v11, 0.0 }
  0xd8   :  { %v1026_v8 = vpop.f32.mrf.mxu0 }
  0xd9   :  { %v212_v10 = vadd.f32 %v1026_v8, %v1310_v57  ;;  %1059 = vmatprep.mubr.msk.bf16.mxu1 %vm398_vm1, %v343_v6  ;;  %v315_v16 = vmax.f32 %v201_v9, 0.0 }
  0xda   :  { %v203_v12 = vpop.f32.mrf.mxu0  ;;  %1060 = vmatmul.mubr.msk.bf16.vlgmr.msra.gmra.mxu1 %vm398_vm1, %v344_v7 }
  0xdb   :  { %v204_v13 = vadd.f32 %v1310_v57, %v203_v12  ;;  %v318_v14 = vmax.f32 %v212_v10, 0.0 }
  0xdc   :  { %v1029_v15 = vpop.f32.mrf.mxu0 }
  0xdd   :  { %v316_v17 = vmax.f32 %v204_v13, 0.0  ;;  %v346_v21 = vpack.c.bf16 %v318_v14, %v317_v18  ;;  %v225_v25 = vadd.f32 %v1029_v15, %v1310_v57 }
  0xde   :  { %v216_v19 = vpop.f32.mrf.mxu0 }
  0xdf   :  { %v345_v20 = vpack.c.bf16 %v316_v17, %v315_v16  ;;  %v217_v23 = vadd.f32 %v1310_v57, %v216_v19  ;;  %v321_v32 = vmax.f32 %v225_v25, 0.0 }
  0xe0   :  { %v1030_v22 = vpop.f32.mrf.mxu0 }
  0xe1   :  { %v228_v24 = vadd.f32 %v1030_v22, %v1310_v57  ;;  %1063 = vmatprep.mubr.msk.bf16.mxu1 %vm398_vm1, %v345_v20  ;;  %v319_v30 = vmax.f32 %v217_v23, 0.0 }
  0xe2   :  { %v219_v26 = vpop.f32.mrf.mxu0  ;;  %1064 = vmatmul.mubr.msk.bf16.gmra.mxu1 %vm398_vm1, %v346_v21 }
  0xe3   :  { %v220_v27 = vadd.f32 %v1310_v57, %v219_v26  ;;  %v322_v28 = vmax.f32 %v228_v24, 0.0 }
  0xe4   :  { %v1033_v29 = vpop.f32.mrf.mxu0 }
  0xe5   :  { %v320_v31 = vmax.f32 %v220_v27, 0.0  ;;  %v348_v35 = vpack.c.bf16 %v322_v28, %v321_v32  ;;  %v241_v39 = vadd.f32 %v1033_v29, %v1310_v57 }
  0xe6   :  { %v232_v33 = vpop.f32.mrf.mxu0 }
  0xe7   :  { %v347_v34 = vpack.c.bf16 %v320_v31, %v319_v30  ;;  %v233_v37 = vadd.f32 %v1310_v57, %v232_v33  ;;  %v325_v46 = vmax.f32 %v241_v39, 0.0 }
  0xe8   :  { %v1034_v36 = vpop.f32.mrf.mxu0 }
  0xe9   :  { %v244_v38 = vadd.f32 %v1034_v36, %v1310_v57  ;;  %1067 = vmatprep.mubr.msk.bf16.mxu1 %vm398_vm1, %v347_v34  ;;  %v323_v44 = vmax.f32 %v233_v37, 0.0 }
  0xea   :  { %v235_v40 = vpop.f32.mrf.mxu0  ;;  %1068 = vmatmul.mubr.msk.bf16.gmra.mxu1 %vm398_vm1, %v348_v35 }
  0xeb   :  { %v236_v41 = vadd.f32 %v1310_v57, %v235_v40  ;;  %v326_v42 = vmax.f32 %v244_v38, 0.0 }
  0xec   :  { %v1037_v43 = vpop.f32.mrf.mxu0 }
  0xed   :  { %v324_v45 = vmax.f32 %v236_v41, 0.0  ;;  %v350_v49 = vpack.c.bf16 %v326_v42, %v325_v46  ;;  %v257_v53 = vadd.f32 %v1037_v43, %v1310_v57  ;;  %v1363_v41 = vld [vmem:[%s1491_s5] sm:$0x1] }
  0xee   :  { %v248_v47 = vpop.f32.mrf.mxu0  ;;  %1013 = vmatprep.mubr.msk.f32.mxu0 %vm101_vm0, %v1363_v41 }
  0xef   :  { %v349_v48 = vpack.c.bf16 %v324_v45, %v323_v44  ;;  %v249_v51 = vadd.f32 %v1310_v57, %v248_v47  ;;  %v329_v61 = vmax.f32 %v257_v53, 0.0  ;;  %v1131_v44 = vmov 0  }
  0xf0   :  { %v1038_v50 = vpop.f32.mrf.mxu0  ;;  %1094 = vset.pattern.permute.xlu0 %v1131_v44 }
  0xf1   :  { %v260_v52 = vadd.f32 %v1038_v50, %v1310_v57  ;;  %1071 = vmatprep.mubr.msk.bf16.mxu1 %vm398_vm1, %v349_v48  ;;  %v327_v59 = vmax.f32 %v249_v51, 0.0 }
  0xf2   :  { %v251_v54 = vpop.f32.mrf.mxu0  ;;  %1072 = vmatmul.mubr.msk.bf16.gmra.mxu1 %vm398_vm1, %v350_v49 }
  0xf3   :  { %v252_v55 = vadd.f32 %v1310_v57, %v251_v54  ;;  %v330_v56 = vmax.f32 %v260_v52, 0.0 }
  0xf4   :  { %v1041_v58 = vpop.f32.mrf.mxu0 }
  0xf5   :  { %v328_v60 = vmax.f32 %v252_v55, 0.0  ;;  %v352_v0 = vpack.c.bf16 %v330_v56, %v329_v61  ;;  %v273_v4 = vadd.f32 %v1041_v58, %v1310_v57 }
  0xf6   :  { %v264_v62 = vpop.f32.mrf.mxu0 }
  0xf7   :  { %v351_v63 = vpack.c.bf16 %v328_v60, %v327_v59  ;;  %v265_v2 = vadd.f32 %v1310_v57, %v264_v62  ;;  %v333_v11 = vmax.f32 %v273_v4, 0.0 }
  0xf8   :  { %v1042_v1 = vpop.f32.mrf.mxu0 }
  0xf9   :  { %v276_v3 = vadd.f32 %v1042_v1, %v1310_v57  ;;  %1075 = vmatprep.mubr.msk.bf16.mxu1 %vm398_vm1, %v351_v63  ;;  %v331_v9 = vmax.f32 %v265_v2, 0.0 }
  0xfa   :  { %v267_v5 = vpop.f32.mrf.mxu0  ;;  %1076 = vmatmul.mubr.msk.bf16.gmra.mxu1 %vm398_vm1, %v352_v0 }
  0xfb   :  { %v268_v6 = vadd.f32 %v1310_v57, %v267_v5  ;;  %v334_v7 = vmax.f32 %v276_v3, 0.0 }
  0xfc   :  { %v1045_v8 = vpop.f32.mrf.mxu0 }
  0xfd   :  { %v332_v10 = vmax.f32 %v268_v6, 0.0  ;;  %v354_v14 = vpack.c.bf16 %v334_v7, %v333_v11  ;;  %v289_v18 = vadd.f32 %v1045_v8, %v1310_v57 }
  0xfe   :  { %v280_v12 = vpop.f32.mrf.mxu0 }
  0xff   :  { %v353_v13 = vpack.c.bf16 %v332_v10, %v331_v9  ;;  %v281_v16 = vadd.f32 %v1310_v57, %v280_v12  ;;  %v337_v25 = vmax.f32 %v289_v18, 0.0  ;;  %v1400_v10 = vld [vmem:[%s1490_s4] ss:$0 sm:$0xff]  ;;  %s1133_s4 = smov [#allocation3]  }
 0x100   :  { %v1046_v15 = vpop.f32.mrf.mxu0  ;;  %s862_s29 = sshll.u32 %s1133_s4, 4  ;;  %s863_s29 = int_to_ptr.vmem [resolvable:$true] %s862_s29 }
 0x101   :  { %v292_v17 = vadd.f32 %v1046_v15, %v1310_v57  ;;  %1079 = vmatprep.mubr.msk.bf16.mxu1 %vm398_vm1, %v353_v13  ;;  %v335_v23 = vmax.f32 %v281_v16, 0.0  ;;  %s1109_s30 = scalar_lea.vmem %s863_s29, 32  ;;  %p1114_p1 = scmp.lt.s32.totalorder %s863_s29, %s863_s29 }
 0x102   :  { %v283_v19 = vpop.f32.mrf.mxu0  ;;  %1080 = vmatmul.mubr.msk.bf16.gmra.mxu1 %vm398_vm1, %v354_v14  ;;  %p1110_p0 = scmp.ne.s32.totalorder %s863_s29, %s1109_s30  ;;  %p1115_p2 = scmp.lt.s32.totalorder %s1109_s30, %s1109_s30 }
 0x103   :  { %v284_v20 = vadd.f32 %v1310_v57, %v283_v19  ;;  %v338_v21 = vmax.f32 %v292_v17, 0.0 }
 0x104   :  { %v1049_v22 = vpop.f32.mrf.mxu0  ;;  %p1116_p3 = por %p1115_p2, %p1114_p1 }
 0x105   :  { %v336_v24 = vmax.f32 %v284_v20, 0.0  ;;  %v356_v28 = vpack.c.bf16 %v338_v21, %v337_v25  ;;  %v305_v32 = vadd.f32 %v1049_v22, %v1310_v57 }
 0x106   :  { %v296_v26 = vpop.f32.mrf.mxu0  ;;  %p1117_p4 = pnand %p1116_p3, %p1110_p0 }
 0x107   :  { %v355_v27 = vpack.c.bf16 %v336_v24, %v335_v23  ;;  %v297_v30 = vadd.f32 %v1310_v57, %v296_v26  ;;  %v341_v38 = vmax.f32 %v305_v32, 0.0 }
 0x108   :  { %v1050_v29 = vpop.f32.mrf.mxu0 }
 0x109   :  { %v308_v31 = vadd.f32 %v1050_v29, %v1310_v57  ;;  %1083 = vmatprep.mubr.msk.bf16.mxu1 %vm398_vm1, %v355_v27  ;;  %v339_v36 = vmax.f32 %v297_v30, 0.0 }
 0x10a   :  { %v299_v33 = vpop.f32.mrf.mxu0  ;;  %1084 = vmatmul.mubr.msk.bf16.gmra.mxu1 %vm398_vm1, %v356_v28 }
 0x10b   :  { %v300_v34 = vadd.f32 %v1310_v57, %v299_v33  ;;  %v342_v35 = vmax.f32 %v308_v31, 0.0  ;;  %v641_v57 = vld [vmem:[#allocation2] sm:$0x1] }
 0x10c   :  { %644 = vperm.xlu0 %1094, %v641_v57  }
 0x10d   :  { %v340_v37 = vmax.f32 %v300_v34, 0.0  ;;  %v358_v40 = vpack.c.bf16 %v342_v35, %v341_v38 }
 0x10f   :  { %v357_v39 = vpack.c.bf16 %v340_v37, %v339_v36 }
 0x111   :  { %1087 = vmatprep.mubr.msk.bf16.mxu1 %vm398_vm1, %v357_v39 }
 0x112   :  { %1088 = vmatmul.mubr.msk.bf16.gmra.mxu1 %vm398_vm1, %v358_v40 }
 0x19a   :  { %v1367_v42 = vpop.f32.mrf.mxu1 }
 0x19c   :  { %v1369_v43 = vpop.f32.mrf.mxu1 }
 0x19e   :  { %v1371_v45 = vpop.f32.mrf.mxu1 }
 0x1a0   :  { %v1373_v46 = vpop.f32.mrf.mxu1 }
 0x1a2   :  { %v1375_v47 = vpop.f32.mrf.mxu1 }
 0x1a4   :  { %v1377_v48 = vpop.f32.mrf.mxu1 }
 0x1a6   :  { %v1379_v49 = vpop.f32.mrf.mxu1 }
 0x1a8   :  { %v1381_v50 = vpop.f32.mrf.mxu1 }
 0x1aa   :  { %v1069_v51 = vpop.f32.mrf.mxu1 }
 0x1ab   :  { %v522_v33 = vadd.f32 %v1069_v51, %v1400_v10 }
 0x1ac   :  { %v1383_v52 = vpop.f32.mrf.mxu1 }
 0x1ad   :  { %v618_v37 = vmax.f32 %v522_v33, 0.0  ;;  %v514_v57 = vadd.f32 %v1400_v10, %v1383_v52  ;;  %v506_v52 = vadd.f32 %v1375_v47, %v1400_v10  ;;  %v498_v47 = vadd.f32 %v1400_v10, %v1377_v48 }
 0x1ae   :  { %v1070_v53 = vpop.f32.mrf.mxu1  ;;  %v490_v48 = vadd.f32 %v1367_v42, %v1400_v10  ;;  %v482_v42 = vadd.f32 %v1400_v10, %v1369_v43 }
 0x1af   :  { %v525_v29 = vadd.f32 %v1070_v53, %v1400_v10 }
 0x1b0   :  { %v516_v54 = vpop.f32.mrf.mxu1 }
 0x1b1   :  { %v619_v34 = vmax.f32 %v525_v29, 0.0  ;;  %v517_v38 = vadd.f32 %v1400_v10, %v516_v54  ;;  %v509_v54 = vadd.f32 %v1379_v49, %v1400_v10  ;;  %v614_v49 = vmax.f32 %v506_v52, 0.0 }
 0x1b2   :  { %v1073_v55 = vpop.f32.mrf.mxu1 }
 0x1b3   :  { %v538_v17 = vadd.f32 %v1073_v55, %v1400_v10  ;;  %v617_v44 = vmax.f32 %v517_v38, 0.0  ;;  %v616_v55 = vmax.f32 %v514_v57, 0.0 }
 0x1b4   :  { %v529_v56 = vpop.f32.mrf.mxu1 }
 0x1b5   :  { %v622_v21 = vmax.f32 %v538_v17, 0.0  ;;  %v530_v25 = vadd.f32 %v1400_v10, %v529_v56  ;;  %v608_v17 = vmax.f32 %v482_v42, 0.0 }
 0x1b6   :  { %v1074_v58 = vpop.f32.mrf.mxu1 }
 0x1b7   :  { %v541_v11 = vadd.f32 %v1074_v58, %v1400_v10  ;;  %v620_v30 = vmax.f32 %v530_v25, 0.0 }
 0x1b8   :  { %v532_v59 = vpop.f32.mrf.mxu1 }
 0x1b9   :  { %v623_v18 = vmax.f32 %v541_v11, 0.0  ;;  %v533_v22 = vadd.f32 %v1400_v10, %v532_v59  ;;  %v615_v59 = vmax.f32 %v509_v54, 0.0 }
 0x1ba   :  { %v1385_v60 = vpop.f32.mrf.mxu1 }
 0x1bb   :  { %v621_v26 = vmax.f32 %v533_v22, 0.0 }
 0x1bc   :  { %v1387_v61 = vpop.f32.mrf.mxu1 }
 0x1be   :  { %v1389_v62 = vpop.f32.mrf.mxu1 }
 0x1c0   :  { %v1391_v63 = vpop.f32.mrf.mxu1 }
 0x1c2   :  { %v1081_v0 = vpop.f32.mrf.mxu1 }
 0x1c3   :  { %v570_v56 = vadd.f32 %v1081_v0, %v1400_v10  ;;  %v501_v0 = vadd.f32 %v1400_v10, %v1381_v50  ;;  %v493_v50 = vadd.f32 %v1371_v45, %v1400_v10  ;;  %v610_v45 = vmax.f32 %v490_v48, 0.0 }
 0x1c4   :  { %v1393_v1 = vpop.f32.mrf.mxu1 }
 0x1c6   :  { %v1082_v2 = vpop.f32.mrf.mxu1 }
 0x1c7   :  { %v573_v51 = vadd.f32 %v1082_v2, %v1400_v10  ;;  %v630_v2 = vmax.f32 %v570_v56, 0.0 }
 0x1c8   :  { %v1395_v3 = vpop.f32.mrf.mxu1 }
 0x1c9   :  { %v631_v58 = vmax.f32 %v573_v51, 0.0 }
 0x1ca   :  { %v1085_v4 = vpop.f32.mrf.mxu1 }
 0x1cb   :  { %v586_v31 = vadd.f32 %v1085_v4, %v1400_v10  ;;  %v565_v4 = vadd.f32 %v1400_v10, %v1395_v3  ;;  %v613_v3 = vmax.f32 %v501_v0, 0.0 }
 0x1cc   :  { %v577_v5 = vpop.f32.mrf.mxu1 }
 0x1cd   :  { %v634_v35 = vmax.f32 %v586_v31, 0.0  ;;  %v578_v39 = vadd.f32 %v1400_v10, %v577_v5  ;;  %v562_v5 = vadd.f32 %v1400_v10, %v1393_v1  ;;  %v612_v1 = vmax.f32 %v498_v47, 0.0 }
 0x1ce   :  { %v1086_v6 = vpop.f32.mrf.mxu1 }
 0x1cf   :  { %v589_v27 = vadd.f32 %v1086_v6, %v1400_v10  ;;  %v632_v53 = vmax.f32 %v578_v39, 0.0  ;;  %v629_v6 = vmax.f32 %v565_v4, 0.0 }
 0x1d0   :  { %v580_v7 = vpop.f32.mrf.mxu1 }
 0x1d1   :  { %v635_v32 = vmax.f32 %v589_v27, 0.0  ;;  %v581_v36 = vadd.f32 %v1400_v10, %v580_v7  ;;  %v557_v7 = vadd.f32 %v1389_v62, %v1400_v10  ;;  %v611_v62 = vmax.f32 %v493_v50, 0.0 }
 0x1d2   :  { %v1089_v8 = vpop.f32.mrf.mxu1 }
 0x1d3   :  { %v602_v13 = vadd.f32 %v1089_v8, %v1400_v10  ;;  %v633_v40 = vmax.f32 %v581_v36, 0.0  ;;  %v628_v8 = vmax.f32 %v562_v5, 0.0  ;;  %v627_v11 = vmax.f32 %v557_v7, 0.0 }
 0x1d4   :  { %v593_v9 = vpop.f32.mrf.mxu1 }
 0x1d5   :  { %v638_v19 = vmax.f32 %v602_v13, 0.0  ;;  %v594_v23 = vadd.f32 %v1400_v10, %v593_v9  ;;  %v554_v9 = vadd.f32 %v1385_v60, %v1400_v10  ;;  %v549_v13 = vadd.f32 %v1400_v10, %v1391_v63 }
 0x1d6   :  { %v1090_v12 = vpop.f32.mrf.mxu1  ;;  %v485_v60 = vadd.f32 %v1400_v10, %v1373_v46  ;;  %v647_v46 = vlaneseq }
 0x1d7   :  { %v605_v14 = vadd.f32 %v1090_v12, %v1400_v10  ;;  %v636_v28 = vmax.f32 %v594_v23, 0.0  ;;  %v626_v12 = vmax.f32 %v554_v9, 0.0 }
 0x1d8   :  { %v596_v15 = vpop.f32.mrf.mxu1  ;;  %v609_v63 = vmax.f32 %v485_v60, 0.0  ;;  %vm853_vm2 = vcmp.lt.s32.totalorder %v647_v46, 256 }
 0x1d9   :  { %v639_v16 = vmax.f32 %v605_v14, 0.0  ;;  %v597_v20 = vadd.f32 %v1400_v10, %v596_v15  ;;  %v546_v14 = vadd.f32 %v1400_v10, %v1387_v61  ;;  %v625_v15 = vmax.f32 %v549_v13, 0.0 }
 0x1da   :  { %v648_v61 = vshrl.u32 %v647_v46, 7 }
 0x1db   :  { %981 = vmatprep.subr.msk.mxu0 %vm101_vm0, %v639_v16  ;;  %v637_v24 = vmax.f32 %v597_v20, 0.0  ;;  %v624_v16 = vmax.f32 %v546_v14, 0.0 }
 0x1dc   :  { %982 = vmatpush3.xpose.msk.msra.mxu0 %vm101_vm0, %v623_v18  ;;  %v649_v18 = vsub.s32 0, %v648_v61 }
 0x1dd   :  { %983 = vmatprep.subr.msk.mxu0 %vm101_vm0, %v638_v19  ;;  %v645_v19 = vpop.permute.xlu0 %644 }
 0x1de   :  { %v650_v20 = vrot.slane %v645_v19, %v649_v18 }
 0x1e0   :  { %984 = vmatpush3.xpose.msk.msra.mxu0 %vm101_vm0, %v622_v21 }
 0x1e1   :  { %985 = vmatprep.subr.msk.mxu0 %vm101_vm0, %v637_v24 }
 0x1e4   :  { %986 = vmatpush3.xpose.msk.msra.mxu0 %vm101_vm0, %v621_v26 }
 0x1e5   :  { %987 = vmatprep.subr.msk.mxu0 %vm101_vm0, %v636_v28 }
 0x1e8   :  { %988 = vmatpush3.xpose.msk.msra.mxu0 %vm101_vm0, %v620_v30 }
 0x1e9   :  { %989 = vmatprep.subr.msk.mxu0 %vm101_vm0, %v635_v32 }
 0x1ec   :  { %990 = vmatpush3.xpose.msk.msra.mxu0 %vm101_vm0, %v619_v34 }
 0x1ed   :  { %991 = vmatprep.subr.msk.mxu0 %vm101_vm0, %v634_v35 }
 0x1f0   :  { %992 = vmatpush3.xpose.msk.msra.mxu0 %vm101_vm0, %v618_v37 }
 0x1f1   :  { %993 = vmatprep.subr.msk.mxu0 %vm101_vm0, %v633_v40 }
 0x1f4   :  { %994 = vmatpush3.xpose.msk.msra.mxu0 %vm101_vm0, %v617_v44 }
 0x1f5   :  { %995 = vmatprep.subr.msk.mxu0 %vm101_vm0, %v632_v53 }
 0x1f8   :  { %996 = vmatpush3.xpose.msk.msra.mxu0 %vm101_vm0, %v616_v55 }
 0x1f9   :  { %997 = vmatprep.subr.msk.mxu0 %vm101_vm0, %v631_v58 }
 0x1fc   :  { %998 = vmatpush3.xpose.msk.msra.mxu0 %vm101_vm0, %v615_v59 }
 0x1fd   :  { %999 = vmatprep.subr.msk.mxu0 %vm101_vm0, %v630_v2 }
 0x200   :  { %1000 = vmatpush3.xpose.msk.msra.mxu0 %vm101_vm0, %v614_v49 }
 0x201   :  { %1001 = vmatprep.subr.msk.mxu0 %vm101_vm0, %v629_v6 }
 0x204   :  { %1002 = vmatpush3.xpose.msk.msra.mxu0 %vm101_vm0, %v613_v3 }
 0x205   :  { %1003 = vmatprep.subr.msk.mxu0 %vm101_vm0, %v628_v8 }
 0x208   :  { %1004 = vmatpush3.xpose.msk.msra.mxu0 %vm101_vm0, %v612_v1 }
 0x209   :  { %1005 = vmatprep.subr.msk.mxu0 %vm101_vm0, %v627_v11 }
 0x20c   :  { %1006 = vmatpush3.xpose.msk.msra.mxu0 %vm101_vm0, %v611_v62 }
 0x20d   :  { %1007 = vmatprep.subr.msk.mxu0 %vm101_vm0, %v626_v12 }
 0x210   :  { %1008 = vmatpush3.xpose.msk.msra.mxu0 %vm101_vm0, %v610_v45 }
 0x211   :  { %1009 = vmatprep.subr.msk.mxu0 %vm101_vm0, %v625_v15 }
 0x214   :  { %1010 = vmatpush3.xpose.msk.msra.mxu0 %vm101_vm0, %v609_v63 }
 0x215   :  { %1011 = vmatprep.subr.msk.mxu0 %vm101_vm0, %v624_v16 }
 0x218   :  { %1012 = vmatpush3.xpose.msk.msra.mxu0 %vm101_vm0, %v608_v17 }
 0x21b   :  { %1014 = vmatmul.mubr.msk.f32.vlgmr.msra.gmra.mxu0 %vm101_vm0, %v1363_v41  ;;  %v1132_v41 = vmov 1966171168  }
 0x21c   :  { %v837_v31 = vunpack.c.l.s4 %v1132_v41 }
 0x21e   :  { %v838_v32 = vunpack.c.0.s8 %v837_v31 }
 0x220   :  { %v841_v34 = vsub.s32 %v838_v32, %v648_v61 }
 0x2db   :  { %v816_v21 = vpop.f32.mrf.mxu0 }
 0x2dc   :  { %v817_v22 = vadd.f32 %v816_v21, %v650_v20 }
 0x2dd   :  { %v818_v43 = vpop.f32.mrf.mxu0 }
 0x2de   :  { %v821_v10 = vsub.f32 0.0, %v817_v22  ;;  %v819_v23 = vadd.f32 %v818_v43, %v650_v20 }
 0x2e0   :  { %v823_v24 = vmul.f32 1.442695, %v821_v10  ;;  %v822_v25 = vsub.f32 0.0, %v819_v23 }
 0x2e2   :  { %1101 = vpow2.f32 %v823_v24  ;;  %v825_v26 = vmul.f32 1.442695, %v822_v25 }
 0x2e4   :  { %1103 = vpow2.f32 %v825_v26 }
 0x2ef   :  { %v1102_v27 = vpop.eup %1101 }
 0x2f0   :  { %v827_v28 = vadd.f32 1.0, %v1102_v27 }
 0x2f1   :  { %v1104_v29 = vpop.eup %1103 }
 0x2f2   :  { %v828_v30 = vadd.f32 1.0, %v1104_v29  ;;  %1105 = vrcp.f32 %v827_v28 }
 0x2f4   :  { %1107 = vrcp.f32 %v828_v30 }
 0x2ff   :  { %v1106_v33 = vpop.eup %1105 }
 0x301   :  { %v1108_v35 = vpop.eup %1107 }
 0x302   :  { %v835_v36 = vcombine.low %v1106_v33, %v1108_v35 }
 0x304   :  { %v842_v37 = vrot.slane %v835_v36, %v841_v34 }
 0x306   :  { %v849_v38 = vrot.slane %v842_v37, %v841_v34 }
 0x308   :  { %855 = vst.msk [vmem:[#allocation3] sm:$0x3] %vm853_vm2, %v849_v38 }
 0x309   :  { %1120 = shalt.err (!%p1117_p4)
}
 0x30a   :  { %865 = dma.vmem_to_hbm [thread:$0]  %s863_s29, 32, %s1493_s7, [#allocation4]  }
 0x30b   :  { %1129 = dma.done.wait [#allocation4], 32  }
 0x30c   :  { %1130 = vsyncadd [#allocation4], 4294967264 }
 0x30d   :  { %869 = vsyncpa [#allocation4], 1 }

</bundles_post_ra>
